<compile_context>
chip_gen: v5e
topology: v5e:2x2
jax: 0.10.0
libtpu: 0.0.40
codegen_flags: <defaults>
</compile_context>

<pallas_src>
import functools

import jax
import jax.numpy as jnp
from jax import lax
from jax.experimental import pallas as pl
from jax.experimental.pallas import tpu as pltpu


def _spatial_attn_kernel(taps_ref, bias_ref, x_ref, o_ref, *, C, W, Bt):
    # taps_ref: VMEM (18, HWp) f32 : rows 0..8 = max-channel taps, 9..17 = mean
    #           channel taps; each = conv_w * bn_scale * pad-validity mask.
    # bias_ref: SMEM (1,)      f32 : folded eval-mode BN bias.
    # x_ref   : VMEM (Bt, C, HWp)  : Bt batch rows, lane-dense spatial axis.
    # o_ref   : VMEM (Bt, C, HWp)
    x = x_ref[...]                                                  # (Bt, C, HWp)

    # ---- ChannelPool: max + mean over the channel axis (mean summed in f32) --
    x_max = jnp.max(x, axis=1).astype(jnp.float32)                  # (Bt, HWp)
    x_mean = jnp.sum(x.astype(jnp.float32), axis=1) * (1.0 / C)     # (Bt, HWp)
    pooled = jnp.concatenate([x_max, x_mean], axis=0)               # (2*Bt, HWp)
    HWp = pooled.shape[1]

    # ---- 3x3 "same" conv via XLU rolls on the flat spatial (lane) axis -------
    # One roll per tap shifts both pooled channels of all Bt rows at once.
    # Out-of-image / pad-lane contributions are zeroed because the validity
    # mask is folded into the tap coefficients.  The BN bias is folded into
    # the accumulator init (center tap, no roll needed).
    conv = (taps_ref[4] * pooled[:Bt]
            + taps_ref[13] * pooled[Bt:]
            + bias_ref[0])                                          # (Bt, HWp)
    for di in (-1, 0, 1):
        for dj in (-1, 0, 1):
            if di == 0 and dj == 0:
                continue
            d = di * W + dj
            t = (di + 1) * 3 + (dj + 1)
            shifted = pltpu.roll(pooled, shift=(-d) % HWp, axis=1)  # (2*Bt, HWp)
            conv = conv + taps_ref[t] * shifted[:Bt] + taps_ref[9 + t] * shifted[Bt:]

    # ---- sigmoid + broadcast multiply (re-read x_ref: short live range) ------
    scale = jax.nn.sigmoid(conv).astype(o_ref.dtype)                # (Bt, HWp)
    o_ref[...] = (x_ref[...] * scale[:, None, :]).astype(o_ref.dtype)


def spatial_attn_layer(x, conv_w, bn_gamma, bn_beta, bn_mean, bn_var, eps=1e-5):
    """x: (B, C, H, W) NCHW.  conv_w: (1, 2, 3, 3) PyTorch OIHW layout."""
    B, C, H, W = x.shape
    HW = H * W
    HWp = ((HW + 127) // 128) * 128          # lane-dense: pad to multiple of 128
    itemsize = x.dtype.itemsize

    # ---- Fold eval-mode BatchNorm2d(1) into the conv weights + one bias -----
    bn_scale = (jnp.asarray(bn_gamma, jnp.float32) /
                jnp.sqrt(jnp.asarray(bn_var, jnp.float32) + eps))
    bn_bias = (jnp.asarray(bn_beta, jnp.float32)
               - jnp.asarray(bn_mean, jnp.float32) * bn_scale).reshape(1)

    # ---- Per-tap coefficient vectors over the (padded) flat spatial axis ----
    pos = jnp.arange(HWp, dtype=jnp.int32)
    row, col = pos // W, pos % W
    in_img = pos < HW
    masks = []
    for di in (-1, 0, 1):
        for dj in (-1, 0, 1):
            masks.append(in_img & (row + di >= 0) & (row + di < H)
                         & (col + dj >= 0) & (col + dj < W))
    masks = jnp.stack(masks).astype(jnp.float32)                     # (9, HWp)
    w_folded = conv_w.reshape(2, 9).astype(jnp.float32) * bn_scale   # (2, 9)
    taps = (w_folded[:, :, None] * masks[None, :, :]).reshape(18, HWp)

    # ---- Batch tile: fill sublanes, amortize step cost, respect VMEM --------
    block_budget = 16 * 1024 * 1024           # in+out, double-buffered x blocks
    desired_bt = 8 if itemsize >= 4 else 16
    max_bt_vmem = max(1, block_budget // (4 * C * HWp * itemsize))
    bt = max(1, min(desired_bt, max_bt_vmem, B))
    if B > 1:                                 # keep >= 2 grid steps (v7x: 2 TCs)
        bt = min(bt, -(-B // 2))
    Bp = -(-B // bt) * bt

    x_flat = x.reshape(B, C, HW)
    if HWp != HW or Bp != B:
        x_flat = jnp.pad(x_flat, ((0, Bp - B), (0, 0), (0, HWp - HW)))

    kernel = functools.partial(_spatial_attn_kernel, C=C, W=W, Bt=bt)
    out = pl.pallas_call(
        kernel,
        out_shape=jax.ShapeDtypeStruct((Bp, C, HWp), x.dtype),
        grid_spec=pltpu.PrefetchScalarGridSpec(
            num_scalar_prefetch=0,
            grid=(Bp // bt,),
            in_specs=[
                pl.BlockSpec((18, HWp), lambda b: (0, 0)),            # tap coeffs
                pl.BlockSpec(memory_space=pltpu.MemorySpace.SMEM),    # BN bias
                pl.BlockSpec((bt, C, HWp), lambda b: (b, 0, 0)),      # x
            ],
            out_specs=pl.BlockSpec((bt, C, HWp), lambda b: (b, 0, 0)),
        ),
        compiler_params=pltpu.CompilerParams(
            dimension_semantics=("parallel",),
            vmem_limit_bytes=48 * 1024 * 1024,
        ),
    )(taps, bn_bias, x_flat)

    return out[:B, :, :HW].reshape(B, C, H, W)


def _reference(x, conv_w, bn_gamma, bn_beta, bn_mean, bn_var, eps=1e-5):
    """Plain-JAX reference mirroring the PyTorch forward (eval-mode BN)."""
    x_max = jnp.max(x, axis=1, keepdims=True)
    x_mean = jnp.mean(x, axis=1, keepdims=True)
    pooled = jnp.concatenate([x_max, x_mean], axis=1)                 # (B,2,H,W)
    conv = lax.conv_general_dilated(
        pooled, conv_w, window_strides=(1, 1), padding="SAME",
        dimension_numbers=("NCHW", "OIHW", "NCHW"))
    y = (conv - bn_mean) / jnp.sqrt(bn_var + eps) * bn_gamma + bn_beta
    return x * jax.nn.sigmoid(y)


if __name__ == "__main__":
    key = jax.random.PRNGKey(0)
    k_x, k_w, k_x2, k_w2 = jax.random.split(key, 4)

    # BatchNorm2d(1) eval-mode parameters / running stats (non-trivial values
    # so the folding path is actually exercised).
    bn_gamma = jnp.array(1.2, jnp.float32)
    bn_beta = jnp.array(0.1, jnp.float32)
    bn_mean = jnp.array(0.05, jnp.float32)
    bn_var = jnp.array(1.5, jnp.float32)

    # Case 1: module-consistent shapes (H*W already a multiple of 128).
    B, C, H, W = 2, 4, 16, 16
    x = jax.random.normal(k_x, (B, C, H, W), dtype=jnp.float32)
    conv_w = jax.random.normal(k_w, (1, 2, 3, 3), dtype=jnp.float32) * 0.3

    out = jax.block_until_ready(
        spatial_attn_layer(x, conv_w, bn_gamma, bn_beta, bn_mean, bn_var))
    ref = _reference(x, conv_w, bn_gamma, bn_beta, bn_mean, bn_var)
    assert out.shape == (B, C, H, W)
    assert jnp.allclose(out, ref, rtol=1e-4, atol=1e-5), "case 1 mismatch"

    # Case 2: exercises lane padding (H*W=120 -> 128), batch padding (B=3 -> 4)
    # and the Bt>1 (batched sublane) path.
    B2, C2, H2, W2 = 3, 5, 10, 12
    x2 = jax.random.normal(k_x2, (B2, C2, H2, W2), dtype=jnp.float32)
    conv_w2 = jax.random.normal(k_w2, (1, 2, 3, 3), dtype=jnp.float32) * 0.3

    out2 = jax.block_until_ready(
        spatial_attn_layer(x2, conv_w2, bn_gamma, bn_beta, bn_mean, bn_var))
    ref2 = _reference(x2, conv_w2, bn_gamma, bn_beta, bn_mean, bn_var)
    assert out2.shape == (B2, C2, H2, W2)
    assert jnp.allclose(out2, ref2, rtol=1e-4, atol=1e-5), "case 2 mismatch"

    print("KERNEL_OK")
</pallas_src>

<mosaic_0001>
module attributes {stable_mosaic.version = 11 : i64} {
  func.func @_spatial_attn_kernel(%arg0: i32, %arg1: memref<18x256xf32, #tpu.memory_space<vmem>>, %arg2: memref<1xf32, #tpu.memory_space<smem>>, %arg3: memref<1x4x256xf32, #tpu.memory_space<vmem>>, %arg4: memref<1x4x256xf32, #tpu.memory_space<vmem>>) attributes {dimension_semantics = [#tpu.dimension_semantics<parallel>], iteration_bounds = array<i64: 2>, scalar_prefetch = 0 : i64, scratch_operands = 0 : i64, tpu.core_type = #tpu.core_type<tc>, window_params = [{pipeline_mode = #tpu.pipeline_mode<synchronous>, transform_indices = @transform_0, window_bounds = array<i64: 18, 256>}, {transform_indices = @transform_1, window_bounds = array<i64: 1>}, {transform_indices = @transform_2, window_bounds = array<i64: 1, 4, 256>}, {transform_indices = @transform_3, window_bounds = array<i64: 1, 4, 256>}]} {
    %c0 = arith.constant 0 : index
    %c0_0 = arith.constant 0 : index
    %c0_1 = arith.constant 0 : index
    %0 = vector.load %arg3[%c0, %c0_0, %c0_1] : memref<1x4x256xf32, #tpu.memory_space<vmem>>, vector<1x4x256xf32>
    %cst = arith.constant dense<0xFF800000> : vector<1x256xf32>
    %1 = vector.multi_reduction <maximumf>, %0, %cst [1] : vector<1x4x256xf32> to vector<1x256xf32>
    %cst_2 = arith.constant dense<0.000000e+00> : vector<1x256xf32>
    %2 = vector.multi_reduction <add>, %0, %cst_2 [1] : vector<1x4x256xf32> to vector<1x256xf32>
    %cst_3 = arith.constant 2.500000e-01 : f32
    %3 = vector.broadcast %cst_3 : f32 to vector<1x256xf32>
    %4 = arith.mulf %2, %3 : vector<1x256xf32>
    %5 = tpu.concatenate %1, %4 in 0 : vector<1x256xf32>, vector<1x256xf32> -> vector<2x256xf32>
    %c4 = arith.constant 4 : index
    %c0_4 = arith.constant 0 : index
    %6 = vector.load %arg1[%c4, %c0_4] : memref<18x256xf32, #tpu.memory_space<vmem>>, vector<1x256xf32>
    %7 = vector.shape_cast %6 : vector<1x256xf32> to vector<256xf32>
    %8 = vector.extract_strided_slice %5 {offsets = [0, 0], sizes = [1, 256], strides = [1, 1]} : vector<2x256xf32> to vector<1x256xf32>
    %9 = vector.shape_cast %7 : vector<256xf32> to vector<1x256xf32>
    %10 = arith.mulf %9, %8 : vector<1x256xf32>
    %c13 = arith.constant 13 : index
    %c0_5 = arith.constant 0 : index
    %11 = vector.load %arg1[%c13, %c0_5] : memref<18x256xf32, #tpu.memory_space<vmem>>, vector<1x256xf32>
    %12 = vector.shape_cast %11 : vector<1x256xf32> to vector<256xf32>
    %13 = vector.extract_strided_slice %5 {offsets = [1, 0], sizes = [1, 256], strides = [1, 1]} : vector<2x256xf32> to vector<1x256xf32>
    %14 = vector.shape_cast %12 : vector<256xf32> to vector<1x256xf32>
    %15 = arith.mulf %14, %13 : vector<1x256xf32>
    %16 = arith.addf %10, %15 : vector<1x256xf32>
    %c0_6 = arith.constant 0 : index
    %17 = memref.load %arg2[%c0_6] : memref<1xf32, #tpu.memory_space<smem>>
    %18 = vector.broadcast %17 : f32 to vector<1x256xf32>
    %19 = arith.addf %16, %18 : vector<1x256xf32>
    %c17_i32 = arith.constant 17 : i32
    %20 = tpu.dynamic_rotate %5 by %c17_i32 dim 1 : vector<2x256xf32>, i32 -> vector<2x256xf32>
    %c0_7 = arith.constant 0 : index
    %c0_8 = arith.constant 0 : index
    %21 = vector.load %arg1[%c0_7, %c0_8] : memref<18x256xf32, #tpu.memory_space<vmem>>, vector<1x256xf32>
    %22 = vector.shape_cast %21 : vector<1x256xf32> to vector<256xf32>
    %23 = vector.extract_strided_slice %20 {offsets = [0, 0], sizes = [1, 256], strides = [1, 1]} : vector<2x256xf32> to vector<1x256xf32>
    %24 = vector.shape_cast %22 : vector<256xf32> to vector<1x256xf32>
    %25 = arith.mulf %24, %23 : vector<1x256xf32>
    %26 = arith.addf %19, %25 : vector<1x256xf32>
    %c9 = arith.constant 9 : index
    %c0_9 = arith.constant 0 : index
    %27 = vector.load %arg1[%c9, %c0_9] : memref<18x256xf32, #tpu.memory_space<vmem>>, vector<1x256xf32>
    %28 = vector.shape_cast %27 : vector<1x256xf32> to vector<256xf32>
    %29 = vector.extract_strided_slice %20 {offsets = [1, 0], sizes = [1, 256], strides = [1, 1]} : vector<2x256xf32> to vector<1x256xf32>
    %30 = vector.shape_cast %28 : vector<256xf32> to vector<1x256xf32>
    %31 = arith.mulf %30, %29 : vector<1x256xf32>
    %32 = arith.addf %26, %31 : vector<1x256xf32>
    %c16_i32 = arith.constant 16 : i32
    %33 = tpu.dynamic_rotate %5 by %c16_i32 dim 1 : vector<2x256xf32>, i32 -> vector<2x256xf32>
    %c1 = arith.constant 1 : index
    %c0_10 = arith.constant 0 : index
    %34 = vector.load %arg1[%c1, %c0_10] : memref<18x256xf32, #tpu.memory_space<vmem>>, vector<1x256xf32>
    %35 = vector.shape_cast %34 : vector<1x256xf32> to vector<256xf32>
    %36 = vector.extract_strided_slice %33 {offsets = [0, 0], sizes = [1, 256], strides = [1, 1]} : vector<2x256xf32> to vector<1x256xf32>
    %37 = vector.shape_cast %35 : vector<256xf32> to vector<1x256xf32>
    %38 = arith.mulf %37, %36 : vector<1x256xf32>
    %39 = arith.addf %32, %38 : vector<1x256xf32>
    %c10 = arith.constant 10 : index
    %c0_11 = arith.constant 0 : index
    %40 = vector.load %arg1[%c10, %c0_11] : memref<18x256xf32, #tpu.memory_space<vmem>>, vector<1x256xf32>
    %41 = vector.shape_cast %40 : vector<1x256xf32> to vector<256xf32>
    %42 = vector.extract_strided_slice %33 {offsets = [1, 0], sizes = [1, 256], strides = [1, 1]} : vector<2x256xf32> to vector<1x256xf32>
    %43 = vector.shape_cast %41 : vector<256xf32> to vector<1x256xf32>
    %44 = arith.mulf %43, %42 : vector<1x256xf32>
    %45 = arith.addf %39, %44 : vector<1x256xf32>
    %c15_i32 = arith.constant 15 : i32
    %46 = tpu.dynamic_rotate %5 by %c15_i32 dim 1 : vector<2x256xf32>, i32 -> vector<2x256xf32>
    %c2 = arith.constant 2 : index
    %c0_12 = arith.constant 0 : index
    %47 = vector.load %arg1[%c2, %c0_12] : memref<18x256xf32, #tpu.memory_space<vmem>>, vector<1x256xf32>
    %48 = vector.shape_cast %47 : vector<1x256xf32> to vector<256xf32>
    %49 = vector.extract_strided_slice %46 {offsets = [0, 0], sizes = [1, 256], strides = [1, 1]} : vector<2x256xf32> to vector<1x256xf32>
    %50 = vector.shape_cast %48 : vector<256xf32> to vector<1x256xf32>
    %51 = arith.mulf %50, %49 : vector<1x256xf32>
    %52 = arith.addf %45, %51 : vector<1x256xf32>
    %c11 = arith.constant 11 : index
    %c0_13 = arith.constant 0 : index
    %53 = vector.load %arg1[%c11, %c0_13] : memref<18x256xf32, #tpu.memory_space<vmem>>, vector<1x256xf32>
    %54 = vector.shape_cast %53 : vector<1x256xf32> to vector<256xf32>
    %55 = vector.extract_strided_slice %46 {offsets = [1, 0], sizes = [1, 256], strides = [1, 1]} : vector<2x256xf32> to vector<1x256xf32>
    %56 = vector.shape_cast %54 : vector<256xf32> to vector<1x256xf32>
    %57 = arith.mulf %56, %55 : vector<1x256xf32>
    %58 = arith.addf %52, %57 : vector<1x256xf32>
    %c1_i32 = arith.constant 1 : i32
    %59 = tpu.dynamic_rotate %5 by %c1_i32 dim 1 : vector<2x256xf32>, i32 -> vector<2x256xf32>
    %c3 = arith.constant 3 : index
    %c0_14 = arith.constant 0 : index
    %60 = vector.load %arg1[%c3, %c0_14] : memref<18x256xf32, #tpu.memory_space<vmem>>, vector<1x256xf32>
    %61 = vector.shape_cast %60 : vector<1x256xf32> to vector<256xf32>
    %62 = vector.extract_strided_slice %59 {offsets = [0, 0], sizes = [1, 256], strides = [1, 1]} : vector<2x256xf32> to vector<1x256xf32>
    %63 = vector.shape_cast %61 : vector<256xf32> to vector<1x256xf32>
    %64 = arith.mulf %63, %62 : vector<1x256xf32>
    %65 = arith.addf %58, %64 : vector<1x256xf32>
    %c12 = arith.constant 12 : index
    %c0_15 = arith.constant 0 : index
    %66 = vector.load %arg1[%c12, %c0_15] : memref<18x256xf32, #tpu.memory_space<vmem>>, vector<1x256xf32>
    %67 = vector.shape_cast %66 : vector<1x256xf32> to vector<256xf32>
    %68 = vector.extract_strided_slice %59 {offsets = [1, 0], sizes = [1, 256], strides = [1, 1]} : vector<2x256xf32> to vector<1x256xf32>
    %69 = vector.shape_cast %67 : vector<256xf32> to vector<1x256xf32>
    %70 = arith.mulf %69, %68 : vector<1x256xf32>
    %71 = arith.addf %65, %70 : vector<1x256xf32>
    %c255_i32 = arith.constant 255 : i32
    %72 = tpu.dynamic_rotate %5 by %c255_i32 dim 1 : vector<2x256xf32>, i32 -> vector<2x256xf32>
    %c5 = arith.constant 5 : index
    %c0_16 = arith.constant 0 : index
    %73 = vector.load %arg1[%c5, %c0_16] : memref<18x256xf32, #tpu.memory_space<vmem>>, vector<1x256xf32>
    %74 = vector.shape_cast %73 : vector<1x256xf32> to vector<256xf32>
    %75 = vector.extract_strided_slice %72 {offsets = [0, 0], sizes = [1, 256], strides = [1, 1]} : vector<2x256xf32> to vector<1x256xf32>
    %76 = vector.shape_cast %74 : vector<256xf32> to vector<1x256xf32>
    %77 = arith.mulf %76, %75 : vector<1x256xf32>
    %78 = arith.addf %71, %77 : vector<1x256xf32>
    %c14 = arith.constant 14 : index
    %c0_17 = arith.constant 0 : index
    %79 = vector.load %arg1[%c14, %c0_17] : memref<18x256xf32, #tpu.memory_space<vmem>>, vector<1x256xf32>
    %80 = vector.shape_cast %79 : vector<1x256xf32> to vector<256xf32>
    %81 = vector.extract_strided_slice %72 {offsets = [1, 0], sizes = [1, 256], strides = [1, 1]} : vector<2x256xf32> to vector<1x256xf32>
    %82 = vector.shape_cast %80 : vector<256xf32> to vector<1x256xf32>
    %83 = arith.mulf %82, %81 : vector<1x256xf32>
    %84 = arith.addf %78, %83 : vector<1x256xf32>
    %c241_i32 = arith.constant 241 : i32
    %85 = tpu.dynamic_rotate %5 by %c241_i32 dim 1 : vector<2x256xf32>, i32 -> vector<2x256xf32>
    %c6 = arith.constant 6 : index
    %c0_18 = arith.constant 0 : index
    %86 = vector.load %arg1[%c6, %c0_18] : memref<18x256xf32, #tpu.memory_space<vmem>>, vector<1x256xf32>
    %87 = vector.shape_cast %86 : vector<1x256xf32> to vector<256xf32>
    %88 = vector.extract_strided_slice %85 {offsets = [0, 0], sizes = [1, 256], strides = [1, 1]} : vector<2x256xf32> to vector<1x256xf32>
    %89 = vector.shape_cast %87 : vector<256xf32> to vector<1x256xf32>
    %90 = arith.mulf %89, %88 : vector<1x256xf32>
    %91 = arith.addf %84, %90 : vector<1x256xf32>
    %c15 = arith.constant 15 : index
    %c0_19 = arith.constant 0 : index
    %92 = vector.load %arg1[%c15, %c0_19] : memref<18x256xf32, #tpu.memory_space<vmem>>, vector<1x256xf32>
    %93 = vector.shape_cast %92 : vector<1x256xf32> to vector<256xf32>
    %94 = vector.extract_strided_slice %85 {offsets = [1, 0], sizes = [1, 256], strides = [1, 1]} : vector<2x256xf32> to vector<1x256xf32>
    %95 = vector.shape_cast %93 : vector<256xf32> to vector<1x256xf32>
    %96 = arith.mulf %95, %94 : vector<1x256xf32>
    %97 = arith.addf %91, %96 : vector<1x256xf32>
    %c240_i32 = arith.constant 240 : i32
    %98 = tpu.dynamic_rotate %5 by %c240_i32 dim 1 : vector<2x256xf32>, i32 -> vector<2x256xf32>
    %c7 = arith.constant 7 : index
    %c0_20 = arith.constant 0 : index
    %99 = vector.load %arg1[%c7, %c0_20] : memref<18x256xf32, #tpu.memory_space<vmem>>, vector<1x256xf32>
    %100 = vector.shape_cast %99 : vector<1x256xf32> to vector<256xf32>
    %101 = vector.extract_strided_slice %98 {offsets = [0, 0], sizes = [1, 256], strides = [1, 1]} : vector<2x256xf32> to vector<1x256xf32>
    %102 = vector.shape_cast %100 : vector<256xf32> to vector<1x256xf32>
    %103 = arith.mulf %102, %101 : vector<1x256xf32>
    %104 = arith.addf %97, %103 : vector<1x256xf32>
    %c16 = arith.constant 16 : index
    %c0_21 = arith.constant 0 : index
    %105 = vector.load %arg1[%c16, %c0_21] : memref<18x256xf32, #tpu.memory_space<vmem>>, vector<1x256xf32>
    %106 = vector.shape_cast %105 : vector<1x256xf32> to vector<256xf32>
    %107 = vector.extract_strided_slice %98 {offsets = [1, 0], sizes = [1, 256], strides = [1, 1]} : vector<2x256xf32> to vector<1x256xf32>
    %108 = vector.shape_cast %106 : vector<256xf32> to vector<1x256xf32>
    %109 = arith.mulf %108, %107 : vector<1x256xf32>
    %110 = arith.addf %104, %109 : vector<1x256xf32>
    %c239_i32 = arith.constant 239 : i32
    %111 = tpu.dynamic_rotate %5 by %c239_i32 dim 1 : vector<2x256xf32>, i32 -> vector<2x256xf32>
    %c8 = arith.constant 8 : index
    %c0_22 = arith.constant 0 : index
    %112 = vector.load %arg1[%c8, %c0_22] : memref<18x256xf32, #tpu.memory_space<vmem>>, vector<1x256xf32>
    %113 = vector.shape_cast %112 : vector<1x256xf32> to vector<256xf32>
    %114 = vector.extract_strided_slice %111 {offsets = [0, 0], sizes = [1, 256], strides = [1, 1]} : vector<2x256xf32> to vector<1x256xf32>
    %115 = vector.shape_cast %113 : vector<256xf32> to vector<1x256xf32>
    %116 = arith.mulf %115, %114 : vector<1x256xf32>
    %117 = arith.addf %110, %116 : vector<1x256xf32>
    %c17 = arith.constant 17 : index
    %c0_23 = arith.constant 0 : index
    %118 = vector.load %arg1[%c17, %c0_23] : memref<18x256xf32, #tpu.memory_space<vmem>>, vector<1x256xf32>
    %119 = vector.shape_cast %118 : vector<1x256xf32> to vector<256xf32>
    %120 = vector.extract_strided_slice %111 {offsets = [1, 0], sizes = [1, 256], strides = [1, 1]} : vector<2x256xf32> to vector<1x256xf32>
    %121 = vector.shape_cast %119 : vector<256xf32> to vector<1x256xf32>
    %122 = arith.mulf %121, %120 : vector<1x256xf32>
    %123 = arith.addf %117, %122 : vector<1x256xf32>
    %124 = arith.negf %123 : vector<1x256xf32>
    %125 = math.exp %124 : vector<1x256xf32>
    %cst_24 = arith.constant 1.000000e+00 : f32
    %126 = vector.broadcast %cst_24 : f32 to vector<1x256xf32>
    %127 = arith.addf %126, %125 : vector<1x256xf32>
    %128 = arith.divf %126, %127 : vector<1x256xf32>
    %c0_25 = arith.constant 0 : index
    %c0_26 = arith.constant 0 : index
    %c0_27 = arith.constant 0 : index
    %129 = vector.load %arg3[%c0_25, %c0_26, %c0_27] : memref<1x4x256xf32, #tpu.memory_space<vmem>>, vector<1x4x256xf32>
    %130 = vector.shape_cast %128 : vector<1x256xf32> to vector<1x1x256xf32>
    %131 = vector.broadcast %130 : vector<1x1x256xf32> to vector<1x4x256xf32>
    %132 = arith.mulf %129, %131 : vector<1x4x256xf32>
    %c0_28 = arith.constant 0 : index
    %c0_29 = arith.constant 0 : index
    %c0_30 = arith.constant 0 : index
    %133 = vector.load %arg4[%c0_28, %c0_29, %c0_30] : memref<1x4x256xf32, #tpu.memory_space<vmem>>, vector<1x4x256xf32>
    tpu.vector_store %arg4[%c0_28, %c0_29, %c0_30], %132 {strides = array<i32>} : memref<1x4x256xf32, #tpu.memory_space<vmem>>, vector<1x4x256xf32>,
    return
  }
  func.func @transform_0(%arg0: i32) -> (i32, i32) {
    %c0_i32 = arith.constant 0 : i32
    %c0_i32_0 = arith.constant 0 : i32
    %c0_i32_1 = arith.constant 0 : i32
    return %c0_i32, %c0_i32_0 : i32, i32
  }
  func.func @transform_1(%arg0: i32) -> i32 {
    %c0_i32 = arith.constant 0 : i32
    %c0_i32_0 = arith.constant 0 : i32
    return %c0_i32 : i32
  }
  func.func @transform_2(%arg0: i32) -> (i32, i32, i32) {
    %c0_i32 = arith.constant 0 : i32
    %c0_i32_0 = arith.constant 0 : i32
    %c0_i32_1 = arith.constant 0 : i32
    return %arg0, %c0_i32, %c0_i32_0 : i32, i32, i32
  }
  func.func @transform_3(%arg0: i32) -> (i32, i32, i32) {
    %c0_i32 = arith.constant 0 : i32
    %c0_i32_0 = arith.constant 0 : i32
    %c0_i32_1 = arith.constant 0 : i32
    return %arg0, %c0_i32, %c0_i32_0 : i32, i32, i32
  }
}

</mosaic_0001>

<bundles_post_ra>
// kernel: tpu_custom_call.1
= control target key start
LH: loop header
LB: loop body
LE: loop exit
PB: predicated region body
PF: predicated region fallthrough
CT: control target
= control target key end

     0   :  { %s1027_s0 = inlined_call_operand.hbm [shape: f32[18,256], index: 0, kind: input, shape index: {}]   ;;  %s1028_s1 = inlined_call_operand.<no memory space> [shape: f32[1], index: 1, kind: input, shape index: {}]   ;;  %s1029_s2 = inlined_call_operand.hbm [shape: f32[2,4,256], index: 2, kind: input, shape index: {}]   ;;  %s1030_s3 = inlined_call_operand.hbm [shape: f32[2,4,256], index: 3, kind: output, shape index: {}]  }
   0x1   :  { %8 = sst [smem:[#allocation2]] %s1028_s1 }
   0x2   :  { %9 = vsyncpa [#allocation4], 0 }
   0x3   :  { %10 = vsyncpa [#allocation7], 0 }
   0x4   :  { %12 = vsyncpa [#allocation7 + $0x1], 0 }
   0x5   :  { %13 = vsyncpa [#allocation5], 0 }
   0x6   :  { %15 = vsyncpa [#allocation5 + $0x1], 0  ;;  %s856_s14 = smov 0   ;;  %s858_s15 = smov 0  }
   0x7   :  { %s860_s16 = smov 0   ;;  %s862_s17 = smov 0  }
   0x8 LB: > { %s131_s19 = sshll.u32 %s1027_s0, 4  ;;  %s880_s20 = sadd.s32 4294967295, %s820_s17   ;;  %s820_s17 = sphi %s862_s17, %s1040_s17   ;;  %s816_s16 = sphi %s860_s16, %s1039_s16   ;;  %s812_s15 = sphi %s858_s15, %s1038_s15   ;;  %s808_s14 = sphi %s856_s14, %s1037_s14   ;;  %s132_s19 = int_to_ptr.hbm [resolvable:$true] %s131_s19 }
   0x9   : > { %p601_p0 = scmp.ge.s32.totalorder %s820_s17, 1  ;;  %p84_p1 = scmp.eq.s32.totalorder %s880_s20, 0 }
   0xa   : > { %p120_p2 = scmp.lt.s32.totalorder %s820_s17, 3  ;;  %s822_s22 = smov [#allocation3]  }
   0xb   : > { %s133_s23 = sshll.u32 %s822_s22, 4  ;;  %s823_s24 = smov 256   ;;  %s134_s23 = int_to_ptr.vmem [resolvable:$true] %s133_s23 }
   0xc   : > { %p885_p3 = pnand %p601_p0, %p120_p2  ;;  %s824_s25 = smov 16  }
   0xd   : > { %s600_s26 = sadd.s32 4294967294, %s820_s17   ;;  %s896_s27 = sadd.s32 1, %s820_s17  }
   0xe   : > { %p627_p4 = pneg %p885_p3  ;;  %s70_s28 = sadd.s32 1, %s816_s16 }
   0xf   : > { %s67_s29 = ssub.s32 %s820_s17, %s896_s27  ;;  %p77_p7 = scmp.ne.s32.totalorder %s816_s16, %s812_s15 }
  0x10   : > { %p628_p6 = pnand %p627_p4, %p84_p1  ;;  %p68_p8 = scmp.eq.s32.totalorder %s67_s29, 0 }
  0x11   : > { %p78_p9 = scmp.eq.s32.totalorder %s820_s17, 0  ;;  %p83_p10 = scmp.ne.s32.totalorder %s812_s15, %s808_s14 }
  0x12   : > { %630 = dma.hbm_to_vmem [thread:$0]  (!%p628_p6), %s132_s19, 768, %s134_s23, [#allocation4], %s823_s24, %s823_s24, %s824_s25  }
  0x13   : > { %p107_p11 = scmp.eq.s32.totalorder %s880_s20, 1  ;;  %p912_p12 = por %p84_p1, %p83_p10 }
  0x14   : > { %s908_s30 = scalar_select %p68_p8, %s816_s16, %s70_s28  }
  0x15   : > { %p916_p13 = por %p107_p11, %p77_p7  ;;  %p113_p0 = scmp.eq.s32.totalorder %s600_s26, 1 }
  0x16   : > { %p79_p2 = por %p78_p9, %p77_p7  ;;  %s150_s6 = sand.u32 1, %s816_s16  }
  0x17   : > { %p921_p4 = por %p113_p0, %p83_p10  ;;  %p640_p6 = scmp.lt.s32.totalorder %s820_s17, 2 }
  0x18   : > { %s604_s8 = sshll.u32 %s150_s6, 3  ;;  %s617_s9 = sshll.u32 %s820_s17, 3 }
  0x19   : > { %s159_s12 = scalar_lea.hbm %s1029_s2, %s617_s9  ;;  %s154_s1 = scalar_lea.vmem [#allocation6], %s604_s8 }
  0x1a   : > { %s161_s13 = sshll.u32 %s159_s12, 4  ;;  %s163_s18 = sshll.u32 %s154_s1, 4  ;;  %s162_s13 = int_to_ptr.hbm [resolvable:$true] %s161_s13  ;;  %s164_s18 = int_to_ptr.vmem [resolvable:$true] %s163_s18 }
  0x1b   : > { %p930_p8 = pnand %p640_p6, %p79_p2  ;;  %s151_s22 = scalar_lea.sflag [#allocation7], %s150_s6 }
  0x1c   : > { %s720_s23 = sshra.s32 %s162_s13, 4  ;;  %s727_s28 = scalar_lea.hbm %s1029_s2, 16  ;;  %s721_s23 = int_to_ptr.hbm [resolvable:$true] %s720_s23 }
  0x1d   : > { %s722_s24 = scalar_lea.hbm %s721_s23, 8  ;;  %p724_p9 = pneg %p930_p8 }
  0x1e   : > { %p723_p7 = scmp.ne.s32.totalorder %s721_s23, %s722_s24  ;;  %p728_p0 = scmp.lt.s32.totalorder %s721_s23, %s1029_s2 }
  0x1f   : > { %p729_p2 = scmp.lt.s32.totalorder %s727_s28, %s722_s24 }
  0x20   : > { %p725_p10 = pnand %p724_p9, %p723_p7 }
  0x21   : > { %p730_p6 = por %p729_p2, %p728_p0 }
  0x22   : > { %p726_p11 = pneg %p725_p10 }
  0x24   : > { %p731_p5 = pnand %p730_p6, %p726_p11 }
  0x26   : > { %734 = shalt.err (!%p731_p5)
}
  0x27   : > { %634 = dma.hbm_to_vmem [thread:$0]  (!%p930_p8), %s162_s13, 128, %s164_s18, %s151_s22  }
  0x28   : > { %172 = sbr.rel (%p885_p3) target bundleno = 321 (0x141), region = 32 }
  0x2d   : > { %795 = dma.done.wait (%p84_p1), [#allocation4], 768  }
  0x2e   : > { %797 = vsyncadd (%p84_p1), [#allocation4], 4294966528  ;;  %s951_s6 = sand.u32 1, %s812_s15  }
  0x2f   : > { %s609_s9 = sshll.u32 %s951_s6, 3  ;;  %s180_s10 = scalar_lea.sflag [#allocation7], %s951_s6 }
  0x30   : > { %s183_s11 = scalar_lea.vmem [#allocation6], %s609_s9 }
  0x31   : > { %799 = dma.done.wait (%p912_p12), %s180_s10, 128  }
  0x32   : > { %801 = vsyncadd (%p912_p12), %s180_s10, 4294967168  ;;  %v961_v0 = vld [vmem:[%s183_s11] sm:$0xff]  ;;  %vm214_vm0 = vcmask 1043456   ;;  %vm250_vm1 = vcmask 1040384   ;;  %s825_s21 = smov 16   ;;  %s826_s4 = smov 17   ;;  %v277_v37 = vlaneseq }
  0x33   : > { %209 = vst [vmem:[#allocation1] ss:$2 sm:$0xff] %v961_v0  ;;  %s827_s12 = smov 15   ;;  %s828_s13 = smov 1  }
  0x34   : > { %s829_s1 = smov 127   ;;  %s830_s18 = smov 113   ;;  %v971_v39 = vand.u32 127, %v277_v37  ;;  %v254_v51 = vld [vmem:[#allocation3 + $0x4] ss:$8 sm:$0x3] }
  0x35   : > { %s831_s19 = smov 112   ;;  %s832_s22 = smov 111   ;;  %v262_v52 = vld [vmem:[#allocation3 + $0x15] ss:$8 sm:$0x3] }
  0x36   : > { %vm279_vm2 = vcmp.lt.s32.totalorder %v971_v39, 17  ;;  %vm303_vm3 = vcmp.lt.s32.totalorder %v971_v39, 16  ;;  %s270_s23 = sld [smem:[#allocation2]]  ;;  %vm328_vm4 = vcmp.lt.s32.totalorder %v971_v39, 15  ;;  %vm353_vm5 = vcmp.lt.s32.totalorder %v971_v39, 1  ;;  %s618_s24 = sshll.u32 %s880_s20, 3 }
  0x37   : > { %vm378_vm6 = vcmp.lt.s32.totalorder %v971_v39, 127  ;;  %vm403_vm7 = vcmp.lt.s32.totalorder %v971_v39, 113  ;;  %vm428_vm8 = vcmp.lt.s32.totalorder %v971_v39, 112  ;;  %vm453_vm9 = vcmp.lt.s32.totalorder %v971_v39, 111  ;;  %s513_s28 = scalar_lea.hbm %s1030_s3, %s618_s24  ;;  %s206_s29 = scalar_lea.vmem [#allocation8], %s609_s9 }
  0x38   : > { %s515_s8 = sshll.u32 %s206_s29, 4  ;;  %s517_s10 = sshll.u32 %s513_s28, 4  ;;  %s516_s8 = int_to_ptr.vmem [resolvable:$true] %s515_s8  ;;  %s518_s10 = int_to_ptr.hbm [resolvable:$true] %s517_s10 }
  0x39   : > { %s502_s20 = scalar_lea.sflag [#allocation5], %s951_s6  ;;  %s764_s11 = sshra.s32 %s518_s10, 4  ;;  %s765_s11 = int_to_ptr.hbm [resolvable:$true] %s764_s11 }
  0x3a   : > { %v210_v1 = vld.sshfl [vmem:[#allocation1] sm:$0xff pattern:$0x75316420]  ;;  %v211_v2 = vld.sshfl [vmem:[#allocation1 + $0x8] sm:$0xff pattern:$0x75316420]  ;;  %p771_p12 = scmp.lt.s32.totalorder %s765_s11, %s1030_s3 }
  0x3b   : > { %v215_v3 = vsel %vm214_vm0, %v210_v1, -inf  ;;  %229 = vst [vmem:[#allocation1] ss:$2 sm:$0xff] %v961_v0  ;;  %v222_v4 = vsel %vm214_vm0, %v211_v2, -inf  ;;  %s770_s9 = scalar_lea.hbm %s1030_s3, 16 }
  0x3c   : > { %v216_v5 = vrot.slane %v215_v3, 4  ;;  %v223_v6 = vrot.slane %v222_v4, 4  ;;  %v271_v63 = vstv %s270_s23  ;;  %v282_v1 = vld [vmem:[#allocation3] ss:$8 sm:$0x3] }
  0x3e   : > { %v217_v7 = vmax.f32 %v215_v3, %v216_v5  ;;  %v224_v8 = vmax.f32 %v222_v4, %v223_v6  ;;  %v291_v5 = vld [vmem:[#allocation3 + $0x11] ss:$8 sm:$0x3] }
  0x40   : > { %v218_v9 = vrot.slane %v217_v7, 2  ;;  %v225_v13 = vrot.slane %v224_v8, 2 }
  0x42   : > { %v230_v10 = vld.sshfl [vmem:[#allocation1] sm:$0xff pattern:$0x75316420]  ;;  %v231_v11 = vld.sshfl [vmem:[#allocation1 + $0x8] sm:$0xff pattern:$0x75316420]  ;;  %v219_v17 = vmax.f32 %v217_v7, %v218_v9  ;;  %v226_v20 = vmax.f32 %v224_v8, %v225_v13 }
  0x43   : > { %v234_v12 = vsel %vm214_vm0, %v230_v10, 0.0  ;;  %v241_v14 = vsel %vm214_vm0, %v231_v11, 0.0  ;;  %v307_v13 = vld [vmem:[#allocation3 + $0x1] ss:$8 sm:$0x3] }
  0x44   : > { %v235_v15 = vrot.slane %v234_v12, 4  ;;  %v242_v16 = vrot.slane %v241_v14, 4  ;;  %v220_v23 = vrot.slane %v219_v17, 1  ;;  %v227_v26 = vrot.slane %v226_v20, 1 }
  0x46   : > { %v236_v18 = vadd.f32 %v235_v15, %v234_v12  ;;  %v243_v19 = vadd.f32 %v242_v16, %v241_v14  ;;  %v221_v29 = vmax.f32 %v219_v17, %v220_v23  ;;  %v228_v32 = vmax.f32 %v226_v20, %v227_v26  ;;  %v316_v15 = vld [vmem:[#allocation3 + $0x12] ss:$8 sm:$0x3] }
  0x48   : > { %v237_v21 = vrot.slane %v236_v18, 2  ;;  %v244_v22 = vrot.slane %v243_v19, 2 }
  0x4a   : > { %v238_v24 = vadd.f32 %v237_v21, %v236_v18  ;;  %v245_v25 = vadd.f32 %v244_v22, %v243_v19 }
  0x4c   : > { %v239_v27 = vrot.slane %v238_v24, 1  ;;  %v246_v28 = vrot.slane %v245_v25, 1 }
  0x4e   : > { %v240_v30 = vadd.f32 %v239_v27, %v238_v24  ;;  %v247_v31 = vadd.f32 %v246_v28, %v245_v25  ;;  %v332_v24 = vld [vmem:[#allocation3 + $0x2] ss:$8 sm:$0x3]  ;;  %v341_v28 = vld [vmem:[#allocation3 + $0x13] ss:$8 sm:$0x3] }
  0x50   : > { %v248_v33 = vmul.f32 0.25, %v240_v30  ;;  %v249_v34 = vmul.f32 0.25, %v247_v31 }
  0x52   : > { %v251_v35 = vsel %vm250_vm1, %v221_v29, %v248_v33  ;;  %v252_v36 = vsel %vm250_vm1, %v228_v32, %v249_v34  ;;  %v357_v34 = vld [vmem:[#allocation3 + $0x3] ss:$8 sm:$0x3] }
  0x53   : > { %299 = vrot.lane.b32.xlu1 %v251_v35, %s825_s21  ;;  %263 = vst [vmem:[#allocation1] sm:$0xff] %v251_v35  ;;  %273 = vrot.lane.b32.xlu0 %v251_v35, %s826_s4  ;;  %v257_v50 = vrot.slane %v252_v36, 7 }
  0x54   : > { %264 = vst [vmem:[#allocation1 + $0x9] sm:$0xff] %v252_v36  ;;  %324 = vrot.lane.b32.xlu2 %v251_v35, %s827_s12 }
  0x55   : > { %v258_v53 = vsel %vm250_vm1, %v251_v35, %v257_v50 }
  0x56   : > { %v260_v57 = vmul.f32 %v258_v53, %v254_v51  ;;  %v391_v51 = vld [vmem:[#allocation3 + $0x16] ss:$8 sm:$0x3] }
  0x5b   : > { %301 = vrot.lane.b32.xlu1 %v252_v36, %s825_s21  ;;  %275 = vrot.lane.b32.xlu0 %v252_v36, %s826_s4  ;;  %v266_v41 = vld [vmem:[#allocation1 + $0x1] ss:$9 sm:$0xff]  ;;  %s766_s21 = scalar_lea.hbm %s765_s11, 8 }
  0x5c   : > { %326 = vrot.lane.b32.xlu2 %v252_v36, %s827_s12  ;;  %v268_v58 = vmul.f32 %v266_v41, %v262_v52  ;;  %p767_p1 = scmp.ne.s32.totalorder %s765_s11, %s766_s21  ;;  %p772_p8 = scmp.lt.s32.totalorder %s770_s9, %s766_s21 }
  0x5e   : > { %v269_v61 = vadd.f32 %v268_v58, %v260_v57  ;;  %p768_p3 = pnand %p767_p1, %p916_p13  ;;  %p773_p7 = por %p772_p8, %p771_p12 }
  0x60   : > { %v272_v6 = vadd.f32 %v271_v63, %v269_v61  ;;  %v416_v63 = vld [vmem:[#allocation3 + $0x17] ss:$8 sm:$0x3]  ;;  %p769_p5 = pneg %p768_p3 }
  0x62   : > { %p774_p9 = pnand %p773_p7, %p769_p5 }
  0x63   : > { %351 = vrot.lane.b32.xlu1 %v252_v36, %s828_s13  ;;  %349 = vrot.lane.b32.xlu0 %v251_v35, %s828_s13 }
  0x64   : > { %374 = vrot.lane.b32.xlu2 %v251_v35, %s829_s1 }
  0x6b   : > { %376 = vrot.lane.b32.xlu0 %v252_v36, %s829_s1  ;;  %399 = vrot.lane.b32.xlu1 %v251_v35, %s830_s18 }
  0x6c   : > { %401 = vrot.lane.b32.xlu2 %v252_v36, %s830_s18 }
  0x73   : > { %426 = vrot.lane.b32.xlu1 %v252_v36, %s831_s19  ;;  %424 = vrot.lane.b32.xlu0 %v251_v35, %s831_s19 }
  0x74   : > { %449 = vrot.lane.b32.xlu2 %v251_v35, %s832_s22 }
  0x7b   : > { %451 = vrot.lane.b32.xlu0 %v252_v36, %s832_s22 }
  0xae   : > { %v325_v45 = vpop.permute.xlu2 %324 }
  0xb6   : > { %v327_v54 = vpop.permute.xlu2 %326 }
  0xb7   : > { %v330_v56 = vsel %vm328_vm4, %v327_v54, %v325_v45  ;;  %v329_v59 = vsel %vm328_vm4, %v325_v45, %v327_v54 }
  0xb8   : > { %v335_v19 = vrot.slane %v329_v59, 7 }
  0xba   : > { %v336_v27 = vsel %vm250_vm1, %v330_v56, %v335_v19 }
  0xbb   : > { %v338_v32 = vmul.f32 %v336_v27, %v332_v24 }
  0xbe   : > { %v375_v16 = vpop.permute.xlu2 %374 }
  0xc5   : > { %v274_v38 = vpop.permute.xlu0 %273  ;;  %v300_v40 = vpop.permute.xlu1 %299 }
  0xc6   : > { %v402_v36 = vpop.permute.xlu2 %401 }
  0xcd   : > { %v276_v42 = vpop.permute.xlu0 %275  ;;  %v302_v46 = vpop.permute.xlu1 %301 }
  0xce   : > { %v280_v43 = vsel %vm279_vm2, %v274_v38, %v276_v42  ;;  %v281_v44 = vsel %vm279_vm2, %v276_v42, %v274_v38  ;;  %v305_v47 = vsel %vm303_vm3, %v302_v46, %v300_v40  ;;  %v304_v49 = vsel %vm303_vm3, %v300_v40, %v302_v46  ;;  %v366_v40 = vld [vmem:[#allocation3 + $0x14] ss:$8 sm:$0x3] }
  0xcf   : > { %292 = vst [vmem:[#allocation1] sm:$0xff] %v281_v44  ;;  %v285_v60 = vrot.slane %v280_v43, 7  ;;  %v310_v9 = vrot.slane %v304_v49, 7 }
  0xd0   : > { %293 = vst [vmem:[#allocation1 + $0x9] sm:$0xff] %v280_v43 }
  0xd1   : > { %v286_v2 = vsel %vm250_vm1, %v281_v44, %v285_v60  ;;  %v311_v14 = vsel %vm250_vm1, %v305_v47, %v310_v9 }
  0xd2   : > { %v288_v7 = vmul.f32 %v286_v2, %v282_v1  ;;  %v313_v21 = vmul.f32 %v311_v14, %v307_v13  ;;  %v450_v2 = vpop.permute.xlu2 %449 }
  0xd4   : > { %v289_v12 = vadd.f32 %v288_v7, %v272_v6 }
  0xd5   : > { %v350_v62 = vpop.permute.xlu0 %349  ;;  %v352_v3 = vpop.permute.xlu1 %351 }
  0xd6   : > { %v355_v4 = vsel %vm353_vm5, %v352_v3, %v350_v62  ;;  %v354_v10 = vsel %vm353_vm5, %v350_v62, %v352_v3 }
  0xd7   : > { %v295_v48 = vld [vmem:[#allocation1 + $0x1] ss:$9 sm:$0xff]  ;;  %v360_v29 = vrot.slane %v354_v10, 7 }
  0xd8   : > { %317 = vst [vmem:[#allocation1] sm:$0xff] %v305_v47  ;;  %v297_v11 = vmul.f32 %v295_v48, %v291_v5  ;;  %v382_v48 = vld [vmem:[#allocation3 + $0x5] ss:$8 sm:$0x3] }
  0xd9   : > { %318 = vst [vmem:[#allocation1 + $0x9] sm:$0xff] %v304_v49  ;;  %v361_v35 = vsel %vm250_vm1, %v355_v4, %v360_v29 }
  0xda   : > { %v298_v17 = vadd.f32 %v297_v11, %v289_v12  ;;  %v363_v43 = vmul.f32 %v361_v35, %v357_v34  ;;  %v441_v12 = vld [vmem:[#allocation3 + $0x20] ss:$8 sm:$0x3] }
  0xdc   : > { %v314_v25 = vadd.f32 %v313_v21, %v298_v17 }
  0xdd   : > { %v377_v18 = vpop.permute.xlu0 %376  ;;  %v400_v31 = vpop.permute.xlu1 %399 }
  0xde   : > { %v379_v20 = vsel %vm378_vm6, %v375_v16, %v377_v18  ;;  %v380_v26 = vsel %vm378_vm6, %v377_v18, %v375_v16  ;;  %v404_v38 = vsel %vm403_vm7, %v400_v31, %v402_v36  ;;  %v405_v45 = vsel %vm403_vm7, %v402_v36, %v400_v31  ;;  %v457_v18 = vld [vmem:[#allocation3 + $0x10] ss:$8 sm:$0x3] }
  0xdf   : > { %v385_v41 = vrot.slane %v380_v26, 7  ;;  %v410_v52 = vrot.slane %v405_v45, 7 }
  0xe0   : > { %v320_v55 = vld [vmem:[#allocation1 + $0x1] ss:$9 sm:$0xff] }
  0xe1   : > { %342 = vst [vmem:[#allocation1] sm:$0xff] %v330_v56  ;;  %v322_v22 = vmul.f32 %v320_v55, %v316_v15  ;;  %v386_v49 = vsel %vm250_vm1, %v379_v20, %v385_v41  ;;  %v411_v60 = vsel %vm250_vm1, %v404_v38, %v410_v52 }
  0xe2   : > { %343 = vst [vmem:[#allocation1 + $0x9] sm:$0xff] %v329_v59  ;;  %v388_v55 = vmul.f32 %v386_v49, %v382_v48  ;;  %v407_v59 = vld [vmem:[#allocation3 + $0x6] ss:$8 sm:$0x3] }
  0xe3   : > { %v323_v30 = vadd.f32 %v322_v22, %v314_v25  ;;  %v413_v5 = vmul.f32 %v411_v60, %v407_v59  ;;  %v466_v22 = vld [vmem:[#allocation3 + $0x21] ss:$8 sm:$0x3] }
  0xe5   : > { %v339_v37 = vadd.f32 %v338_v32, %v323_v30  ;;  %v425_v46 = vpop.permute.xlu0 %424  ;;  %v427_v53 = vpop.permute.xlu1 %426 }
  0xe6   : > { %v429_v56 = vsel %vm428_vm8, %v425_v46, %v427_v53  ;;  %v430_v58 = vsel %vm428_vm8, %v427_v53, %v425_v46 }
  0xe7   : > { %v435_v1 = vrot.slane %v430_v58, 7 }
  0xe9   : > { %v345_v8 = vld [vmem:[#allocation1 + $0x1] ss:$9 sm:$0xff]  ;;  %v436_v9 = vsel %vm250_vm1, %v429_v56, %v435_v1 }
  0xea   : > { %367 = vst [vmem:[#allocation1] sm:$0xff] %v355_v4  ;;  %v347_v33 = vmul.f32 %v345_v8, %v341_v28  ;;  %v432_v8 = vld [vmem:[#allocation3 + $0x7] ss:$8 sm:$0x3] }
  0xeb   : > { %368 = vst [vmem:[#allocation1 + $0x9] sm:$0xff] %v354_v10  ;;  %v438_v15 = vmul.f32 %v436_v9, %v432_v8 }
  0xec   : > { %v348_v42 = vadd.f32 %v347_v33, %v339_v37 }
  0xed   : > { %v452_v3 = vpop.permute.xlu0 %451 }
  0xee   : > { %v364_v50 = vadd.f32 %v363_v43, %v348_v42  ;;  %v455_v7 = vsel %vm453_vm9, %v452_v3, %v450_v2  ;;  %v454_v11 = vsel %vm453_vm9, %v450_v2, %v452_v3 }
  0xef   : > { %v460_v13 = vrot.slane %v455_v7, 7 }
  0xf1   : > { %v461_v39 = vsel %vm250_vm1, %v454_v11, %v460_v13 }
  0xf2   : > { %v370_v23 = vld [vmem:[#allocation1 + $0x1] ss:$9 sm:$0xff]  ;;  %v463_v21 = vmul.f32 %v461_v39, %v457_v18 }
  0xf3   : > { %392 = vst [vmem:[#allocation1] sm:$0xff] %v379_v20  ;;  %v372_v47 = vmul.f32 %v370_v23, %v366_v40 }
  0xf4   : > { %393 = vst [vmem:[#allocation1 + $0x9] sm:$0xff] %v380_v26 }
  0xf5   : > { %v373_v54 = vadd.f32 %v372_v47, %v364_v50 }
  0xf7   : > { %v389_v62 = vadd.f32 %v388_v55, %v373_v54 }
  0xfb   : > { %v395_v44 = vld [vmem:[#allocation1 + $0x1] ss:$9 sm:$0xff] }
  0xfc   : > { %417 = vst [vmem:[#allocation1] sm:$0xff] %v404_v38  ;;  %v397_v57 = vmul.f32 %v395_v44, %v391_v51 }
  0xfd   : > { %418 = vst [vmem:[#allocation1 + $0x9] sm:$0xff] %v405_v45 }
  0xfe   : > { %v398_v4 = vadd.f32 %v397_v57, %v389_v62 }
 0x100   : > { %v414_v10 = vadd.f32 %v413_v5, %v398_v4 }
 0x104   : > { %v420_v61 = vld [vmem:[#allocation1 + $0x1] ss:$9 sm:$0xff] }
 0x105   : > { %442 = vst [vmem:[#allocation1] sm:$0xff] %v429_v56  ;;  %v422_v6 = vmul.f32 %v420_v61, %v416_v63 }
 0x106   : > { %443 = vst [vmem:[#allocation1 + $0x9] sm:$0xff] %v430_v58 }
 0x107   : > { %v423_v14 = vadd.f32 %v422_v6, %v414_v10 }
 0x109   : > { %v439_v19 = vadd.f32 %v438_v15, %v423_v14 }
 0x10d   : > { %v445_v16 = vld [vmem:[#allocation1 + $0x1] ss:$9 sm:$0xff] }
 0x10e   : > { %467 = vst [vmem:[#allocation1] sm:$0xff] %v454_v11  ;;  %v447_v17 = vmul.f32 %v445_v16, %v441_v12 }
 0x10f   : > { %468 = vst [vmem:[#allocation1 + $0x9] sm:$0xff] %v455_v7 }
 0x110   : > { %v448_v20 = vadd.f32 %v447_v17, %v439_v19 }
 0x112   : > { %v464_v24 = vadd.f32 %v463_v21, %v448_v20 }
 0x116   : > { %v470_v23 = vld [vmem:[#allocation1 + $0x1] ss:$9 sm:$0xff] }
 0x117   : > { %v472_v25 = vmul.f32 %v470_v23, %v466_v22 }
 0x119   : > { %v473_v26 = vadd.f32 %v472_v25, %v464_v24 }
 0x11b   : > { %v611_v27 = vmul.f32 -1.442695, %v473_v26 }
 0x11d   : > { %686 = vpow2.f32 %v611_v27 }
 0x123   : > { %v687_v28 = vpop.eup %686 }
 0x124   : > { %v477_v29 = vadd.f32 1.0, %v687_v28 }
 0x126   : > { %688 = vrcp.f32 %v477_v29  ;;  %v489_v33 = vand.u32 2147483648, %v477_v29  ;;  %v487_v35 = vand.u32 2147483647, %v477_v29  ;;  %vm483_vm11 = vweird.f32 %v477_v29 }
 0x128   : > { %v490_v37 = vor.u32 1.1754944e-38, %v489_v33  ;;  %vm488_vm13 = vcmp.eq.f32.partialorder %v487_v35, 8.507059e+37 }
 0x12c   : > { %v689_v30 = vpop.eup %688 }
 0x12d   : > { %v479_v31 = vmul.f32 %v689_v30, %v477_v29  ;;  %vm484_vm10 = vweird.f32 %v689_v30 }
 0x12e   : > { %vm485_vm12 = vmor %vm483_vm11, %vm484_vm10 }
 0x12f   : > { %v480_v32 = vsub.f32 1.0, %v479_v31 }
 0x131   : > { %v481_v34 = vmul.f32 %v689_v30, %v480_v32 }
 0x133   : > { %v482_v36 = vadd.f32 %v689_v30, %v481_v34 }
 0x135   : > { %v486_v38 = vsel %vm485_vm12, %v689_v30, %v482_v36 }
 0x136   : > { %v491_v40 = vsel %vm488_vm13, %v490_v37, %v486_v38 }
 0x137   : > { %v495_v41 = vperm.slane %v491_v40, 1  ;;  %v494_v42 = vperm.slane %v491_v40, 0 }
 0x139   : > { %v496_v43 = vrot.slane %v495_v41, 4 }
 0x13b   : > { %v497_v44 = vsel %vm214_vm0, %v494_v42, %v496_v43 }
 0x13c   : > { %v499_v45 = vmul.f32 %v497_v44, %v961_v0 }
 0x13e   : > { %500 = vst [vmem:[%s206_s29] sm:$0xff] %v499_v45 }
 0x13f   : > { %777 = shalt.err (!%p774_p9)
}
 0x140   : > { %625 = dma.vmem_to_hbm [thread:$0]  (%p916_p13), %s516_s8, 128, %s518_s10, %s502_s20  }
 0x141 PF: > { %s529_s6 = sand.u32 1, %s808_s14   ;;  %p1036_p10 = scmp.ge.s32.totalorder %s820_s17, 2 }
 0x142   : > { %s530_s18 = scalar_lea.sflag [#allocation5], %s529_s6 }
 0x143   : > { %p636_p11 = pnand %p1036_p10, %p921_p4 }
 0x145   : > { %p637_p0 = pneg %p636_p11 }
 0x147   : > { %803 = dma.done.wait (%p637_p0), %s530_s18, 128  }
 0x148   : > { %805 = vsyncadd (%p637_p0), %s530_s18, 4294967168  ;;  %p18_p2 = scmp.ge.s32.totalorder %s896_s27, 4   ;;  %s1037_s14 = smov %s812_s15 }
 0x149   : > { %s1038_s15 = smov %s816_s16  ;;  %s1039_s16 = smov %s908_s30 }
 0x14a   : > { %s1040_s17 = smov %s896_s27  ;;  %20 = sbr.rel (!%p18_p2) target bundleno = 8 (0x8), region = 108 }
 0x14f   :  { %536 = vsyncpa [#allocation4], 1 }
 0x150   :  { %538 = vsyncpa [#allocation4 + $0x1], 1 }
 0x151   :  { %539 = vsyncpa [#allocation7], 1 }
 0x152   :  { %541 = vsyncpa [#allocation7 + $0x1], 1 }
 0x153   :  { %542 = vsyncpa [#allocation5], 1 }
 0x154   :  { %544 = vsyncpa [#allocation5 + $0x1], 1 }

</bundles_post_ra>
